<compile_context>
chip_gen: v5e
topology: v5e:2x2
jax: 0.10.0
libtpu: 0.0.40
codegen_flags: <defaults>
</compile_context>

<pallas_src>
import functools

import jax
import jax.numpy as jnp
import numpy as np
from jax.experimental import pallas as pl
from jax.experimental.pallas import tpu as pltpu


# ----------------------------------------------------------------------------
# Fused Pallas kernel: y = relu*( ... relu*(x @ W0 + b0) ... @ W_{L-1} + b_{L-1})
# (BatchNorm affine already folded into W/b at parameter-setup time.)
# ----------------------------------------------------------------------------
def fused_mlp_kernel(x_ref, w_ref, b_ref, o_ref, *, n_layers, relu_flags):
    h = x_ref[...]                                   # (TB, D) f32
    for li in range(n_layers):                       # static unroll over layers
        h = jnp.dot(h, w_ref[li],
                    preferred_element_type=jnp.float32)   # MXU
        h = h + b_ref[li]
        if relu_flags[li]:
            h = jnp.maximum(h, 0.0)
    o_ref[...] = h.astype(o_ref.dtype)


def fused_mlp(x_pad, w_stack, b_stack, relu_flags):
    """x_pad: (BSP, D) f32, w_stack: (L, D, D), b_stack: (L, 1, D)."""
    bsp, d = x_pad.shape
    n_layers = w_stack.shape[0]

    # Batch tile: whole (small) batch, capped at 256 rows. BSP is padded to a
    # multiple of TB by the caller.
    tb = min(256, bsp)
    assert bsp % tb == 0

    kern = functools.partial(fused_mlp_kernel,
                             n_layers=n_layers,
                             relu_flags=tuple(bool(r) for r in relu_flags))

    flops = 2 * bsp * d * d * n_layers
    bytes_accessed = 4 * (2 * bsp * d + n_layers * d * d + n_layers * d)

    return pl.pallas_call(
        kern,
        out_shape=jax.ShapeDtypeStruct((bsp, d), jnp.float32),
        grid=(bsp // tb,),
        in_specs=[
            pl.BlockSpec((tb, d), lambda i: (i, 0)),                 # x tile
            pl.BlockSpec((n_layers, d, d), lambda i: (0, 0, 0)),     # weights (resident)
            pl.BlockSpec((n_layers, 1, d), lambda i: (0, 0, 0)),     # biases  (resident)
        ],
        out_specs=pl.BlockSpec((tb, d), lambda i: (i, 0)),
        compiler_params=pltpu.CompilerParams(
            dimension_semantics=("parallel",),
            vmem_limit_bytes=32 * 1024 * 1024),
        cost_estimate=pl.CostEstimate(flops=flops,
                                      bytes_accessed=bytes_accessed,
                                      transcendentals=0),
    )(x_pad, w_stack, b_stack)


# ----------------------------------------------------------------------------
# Helpers
# ----------------------------------------------------------------------------
def _round_up(n, m):
    return ((n + m - 1) // m) * m


def _pad2d(a, rows, cols):
    return jnp.pad(a, ((0, rows - a.shape[0]), (0, cols - a.shape[1])))


# ----------------------------------------------------------------------------
# Parameter construction (deterministic, synthetic)
# ----------------------------------------------------------------------------
def make_params(key, vocab_sizes, embedding_dims, input_channels_cont,
                lib_ftrs, batch_norm=True):
    keys = jax.random.split(key, 64)
    ki = iter(range(64))

    # --- Embedding tables, one per categorical channel ----------------------
    embeddings = []
    for v, e in zip(vocab_sizes, embedding_dims):
        embeddings.append(
            jax.random.normal(keys[next(ki)], (v, e), jnp.float32) * 0.5)

    # Block-diagonal combined table for a single-gather lookup.
    v_total = int(np.sum(vocab_sizes))
    e_total = int(np.sum(embedding_dims))
    big_table = jnp.zeros((v_total, e_total), jnp.float32)
    vocab_offsets = []
    vo, eo = 0, 0
    for emb, v, e in zip(embeddings, vocab_sizes, embedding_dims):
        big_table = big_table.at[vo:vo + v, eo:eo + e].set(emb)
        vocab_offsets.append(vo)
        vo += v
        eo += e
    vocab_offsets = jnp.asarray(vocab_offsets, jnp.int32)

    # --- MLP: bn_drop_lin blocks --------------------------------------------
    input_dim = int(np.sum(embedding_dims) + input_channels_cont)
    lin_ftrs = [input_dim] + list(lib_ftrs)
    n_layers = len(lin_ftrs) - 1

    # Single lane-dense padded width for the whole fused MLP.
    d_pad = _round_up(max(lin_ftrs), 128)

    layers_ref = []           # unfolded, for the pure-JAX reference
    w_pad_list, b_pad_list, relu_flags = [], [], []
    for li, (ni, no) in enumerate(zip(lin_ftrs[:-1], lin_ftrs[1:])):
        if batch_norm:
            gamma = 1.0 + 0.1 * jax.random.normal(keys[next(ki)], (ni,))
            beta = 0.1 * jax.random.normal(keys[next(ki)], (ni,))
            running_mean = 0.1 * jax.random.normal(keys[next(ki)], (ni,))
            running_var = 1.0 + 0.1 * jnp.abs(
                jax.random.normal(keys[next(ki)], (ni,)))
            scale = gamma / jnp.sqrt(running_var + 1e-5)
            shift = beta - running_mean * scale
        else:
            scale = jnp.ones((ni,), jnp.float32)
            shift = jnp.zeros((ni,), jnp.float32)

        # PyTorch Linear weight is (no, ni); store transposed as (ni, no).
        w_pt = jax.random.normal(keys[next(ki)], (no, ni), jnp.float32) * (
            1.0 / np.sqrt(ni))
        w = jnp.asarray(w_pt.T, jnp.float32)                    # (ni, no)
        b = jax.random.normal(keys[next(ki)], (no,), jnp.float32) * 0.05
        relu = li < n_layers - 1

        layers_ref.append(dict(scale=scale, shift=shift, w=w, b=b, relu=relu))

        # Fold eval-mode BN affine into the Linear weights.
        w_folded = scale[:, None] * w                           # (ni, no)
        b_folded = shift @ w + b                                # (no,)

        w_pad_list.append(_pad2d(w_folded, d_pad, d_pad))       # (D, D)
        b_pad_list.append(
            jnp.pad(b_folded, (0, d_pad - no)).reshape(1, d_pad))
        relu_flags.append(relu)

    return dict(
        embeddings=embeddings,
        big_table=big_table,
        vocab_offsets=vocab_offsets,
        input_channels_cont=int(input_channels_cont),
        input_dim=input_dim,
        output_dim=int(lin_ftrs[-1]),
        d_pad=d_pad,
        w_stack=jnp.stack(w_pad_list, axis=0),      # (L, D, D)
        b_stack=jnp.stack(b_pad_list, axis=0),      # (L, 1, D)
        relu_flags=tuple(relu_flags),
        layers_ref=layers_ref,
    )


# ----------------------------------------------------------------------------
# Forward pass (matches BasicEncoderStatic.forward, eval mode)
# ----------------------------------------------------------------------------
def basic_encoder_static_forward(x, params, n_cat):
    assert x.shape[1] == n_cat + params["input_channels_cont"]

    # Single gather from the block-diagonal embedding table == per-channel
    # embedding lookups followed by concatenation.
    cat_idx = x[:, :n_cat].astype(jnp.int32) + params["vocab_offsets"][None, :]
    emb = jnp.take(params["big_table"], cat_idx, axis=0).sum(axis=1)  # (bs, E)
    cont = x[:, n_cat:]
    h = jnp.concatenate([emb, cont], axis=1)                    # (bs, input_dim)

    # Pad batch to a sublane multiple and features to the lane-dense width.
    bs = h.shape[0]
    d_pad = params["d_pad"]
    bs_pad = _round_up(max(bs, 8), 8)
    h_pad = _pad2d(h, bs_pad, d_pad)

    out_pad = fused_mlp(h_pad, params["w_stack"], params["b_stack"],
                        params["relu_flags"])
    return out_pad[:bs, :params["output_dim"]]


# Pure-JAX reference (no Pallas, no folding/padding) for correctness checking.
def reference_forward(x, params, n_cat):
    cat_idx = x[:, :n_cat].astype(jnp.int32)
    res = [params["embeddings"][i][cat_idx[:, i]] for i in range(n_cat)]
    cont = x[:, n_cat:]
    h = jnp.concatenate([jnp.concatenate(res, axis=1), cont], axis=1)
    for layer in params["layers_ref"]:
        h = h * layer["scale"][None, :] + layer["shift"][None, :]
        h = h @ layer["w"] + layer["b"][None, :]
        if layer["relu"]:
            h = jnp.maximum(h, 0.0)
    return h


if __name__ == "__main__":
    # Small, self-consistent hparams:
    #   input_channels_cat = 2, input_channels_cont = 3
    #   vocab_sizes = [5, 7], embedding_dims = [4, 4]  -> input_dim = 11
    #   lib_ftrs = [32, 16] -> MLP 11 -> 32 (ReLU) -> 16
    vocab_sizes = [5, 7]
    embedding_dims = [4, 4]
    input_channels_cont = 3
    lib_ftrs = [32, 16]
    n_cat = len(vocab_sizes)
    bs = 8

    key = jax.random.PRNGKey(0)
    kp, kc, kx = jax.random.split(key, 3)

    params = make_params(kp, vocab_sizes, embedding_dims,
                         input_channels_cont, lib_ftrs, batch_norm=True)

    # Build input x: categorical indices stored as floats (like the torch
    # module, which calls .long() on them), followed by continuous features.
    cat_cols = [
        jax.random.randint(jax.random.fold_in(kc, i), (bs, 1), 0, v).astype(
            jnp.float32)
        for i, v in enumerate(vocab_sizes)
    ]
    cont_cols = jax.random.normal(kx, (bs, input_channels_cont), jnp.float32)
    x = jnp.concatenate(cat_cols + [cont_cols], axis=1)   # (8, 5)

    out = basic_encoder_static_forward(x, params, n_cat)
    out = jax.block_until_ready(out)

    ref = reference_forward(x, params, n_cat)
    np.testing.assert_allclose(np.asarray(out), np.asarray(ref),
                               rtol=1e-4, atol=1e-4)
    assert out.shape == (bs, lib_ftrs[-1])
    print("KERNEL_OK")
</pallas_src>

<mosaic_0001>
module attributes {stable_mosaic.version = 11 : i64} {
  func.func @fused_mlp_kernel(%arg0: i32, %arg1: memref<8x128xf32, #tpu.memory_space<vmem>>, %arg2: memref<2x128x128xf32, #tpu.memory_space<vmem>>, %arg3: memref<2x1x128xf32, #tpu.memory_space<vmem>>, %arg4: memref<8x128xf32, #tpu.memory_space<vmem>>) attributes {dimension_semantics = [#tpu.dimension_semantics<parallel>], iteration_bounds = array<i64: 1>, scalar_prefetch = 0 : i64, scratch_operands = 0 : i64, tpu.core_type = #tpu.core_type<tc>, window_params = [{transform_indices = @transform_0, window_bounds = array<i64: 8, 128>}, {pipeline_mode = #tpu.pipeline_mode<synchronous>, transform_indices = @transform_1, window_bounds = array<i64: 2, 128, 128>}, {pipeline_mode = #tpu.pipeline_mode<synchronous>, transform_indices = @transform_2, window_bounds = array<i64: 2, 1, 128>}, {transform_indices = @transform_3, window_bounds = array<i64: 8, 128>}]} {
    %c0 = arith.constant 0 : index
    %c0_0 = arith.constant 0 : index
    %0 = vector.load %arg1[%c0, %c0_0] : memref<8x128xf32, #tpu.memory_space<vmem>>, vector<8x128xf32>
    %c0_1 = arith.constant 0 : index
    %c0_2 = arith.constant 0 : index
    %c0_3 = arith.constant 0 : index
    %1 = vector.load %arg2[%c0_1, %c0_2, %c0_3] : memref<2x128x128xf32, #tpu.memory_space<vmem>>, vector<1x128x128xf32>
    %2 = vector.shape_cast %1 : vector<1x128x128xf32> to vector<128x128xf32>
    %cst = arith.constant dense<0.000000e+00> : vector<8x128xf32>
    %3 = tpu.matmul %0, %2, %cst {dimension_numbers = #tpu.dot_dimension_numbers<[1], [0], [0], [1], [0, 0, 1, 1], [], []>} : vector<8x128xf32>, vector<128x128xf32>, vector<8x128xf32> -> vector<8x128xf32>
    %c0_4 = arith.constant 0 : index
    %c0_5 = arith.constant 0 : index
    %c0_6 = arith.constant 0 : index
    %4 = vector.load %arg3[%c0_4, %c0_5, %c0_6] : memref<2x1x128xf32, #tpu.memory_space<vmem>>, vector<1x1x128xf32>
    %5 = vector.shape_cast %4 : vector<1x1x128xf32> to vector<1x128xf32>
    %6 = vector.broadcast %5 : vector<1x128xf32> to vector<8x128xf32>
    %7 = arith.addf %3, %6 : vector<8x128xf32>
    %cst_7 = arith.constant 0.000000e+00 : f32
    %8 = vector.broadcast %cst_7 : f32 to vector<8x128xf32>
    %9 = arith.maximumf %7, %8 : vector<8x128xf32>
    %c1 = arith.constant 1 : index
    %c0_8 = arith.constant 0 : index
    %c0_9 = arith.constant 0 : index
    %10 = vector.load %arg2[%c1, %c0_8, %c0_9] : memref<2x128x128xf32, #tpu.memory_space<vmem>>, vector<1x128x128xf32>
    %11 = vector.shape_cast %10 : vector<1x128x128xf32> to vector<128x128xf32>
    %cst_10 = arith.constant dense<0.000000e+00> : vector<8x128xf32>
    %12 = tpu.matmul %9, %11, %cst_10 {dimension_numbers = #tpu.dot_dimension_numbers<[1], [0], [0], [1], [0, 0, 1, 1], [], []>} : vector<8x128xf32>, vector<128x128xf32>, vector<8x128xf32> -> vector<8x128xf32>
    %c1_11 = arith.constant 1 : index
    %c0_12 = arith.constant 0 : index
    %c0_13 = arith.constant 0 : index
    %13 = vector.load %arg3[%c1_11, %c0_12, %c0_13] : memref<2x1x128xf32, #tpu.memory_space<vmem>>, vector<1x1x128xf32>
    %14 = vector.shape_cast %13 : vector<1x1x128xf32> to vector<1x128xf32>
    %15 = vector.broadcast %14 : vector<1x128xf32> to vector<8x128xf32>
    %16 = arith.addf %12, %15 : vector<8x128xf32>
    %c0_14 = arith.constant 0 : index
    %c0_15 = arith.constant 0 : index
    %17 = vector.load %arg4[%c0_14, %c0_15] : memref<8x128xf32, #tpu.memory_space<vmem>>, vector<8x128xf32>
    tpu.vector_store %arg4[%c0_14, %c0_15], %16 {strides = array<i32>} : memref<8x128xf32, #tpu.memory_space<vmem>>, vector<8x128xf32>,
    return
  }
  func.func @transform_0(%arg0: i32) -> (i32, i32) {
    %c0_i32 = arith.constant 0 : i32
    %c0_i32_0 = arith.constant 0 : i32
    return %arg0, %c0_i32 : i32, i32
  }
  func.func @transform_1(%arg0: i32) -> (i32, i32, i32) {
    %c0_i32 = arith.constant 0 : i32
    %c0_i32_0 = arith.constant 0 : i32
    %c0_i32_1 = arith.constant 0 : i32
    %c0_i32_2 = arith.constant 0 : i32
    return %c0_i32, %c0_i32_0, %c0_i32_1 : i32, i32, i32
  }
  func.func @transform_2(%arg0: i32) -> (i32, i32, i32) {
    %c0_i32 = arith.constant 0 : i32
    %c0_i32_0 = arith.constant 0 : i32
    %c0_i32_1 = arith.constant 0 : i32
    %c0_i32_2 = arith.constant 0 : i32
    return %c0_i32, %c0_i32_0, %c0_i32_1 : i32, i32, i32
  }
  func.func @transform_3(%arg0: i32) -> (i32, i32) {
    %c0_i32 = arith.constant 0 : i32
    %c0_i32_0 = arith.constant 0 : i32
    return %arg0, %c0_i32 : i32, i32
  }
}

</mosaic_0001>

<bundles_post_ra>
// kernel: tpu_custom_call.1
= control target key start
LH: loop header
LB: loop body
LE: loop exit
PB: predicated region body
PF: predicated region fallthrough
CT: control target
= control target key end

     0   :  { %8 = vsyncpa [#allocation3], 0  ;;  %s315_s0 = inlined_call_operand.hbm [shape: f32[8,128], index: 0, kind: input, shape index: {}]   ;;  %s316_s1 = inlined_call_operand.hbm [shape: f32[2,128,128], index: 1, kind: input, shape index: {}]   ;;  %s317_s2 = inlined_call_operand.hbm [shape: f32[2,1,128], index: 2, kind: input, shape index: {}]   ;;  %s318_s3 = inlined_call_operand.hbm [shape: f32[8,128], index: 3, kind: output, shape index: {}]  }
   0x1   :  { %9 = vsyncpa [#allocation6], 0  ;;  %s26_s14 = sshll.u32 %s316_s1, 4  ;;  %s27_s14 = int_to_ptr.hbm [resolvable:$true] %s26_s14 }
   0x2   :  { %10 = vsyncpa [#allocation4], 0  ;;  %s275_s15 = smov [#allocation5]   ;;  %s16_s19 = sshll.u32 %s315_s0, 4  ;;  %s17_s19 = int_to_ptr.hbm [resolvable:$true] %s16_s19 }
   0x3   :  { %s28_s16 = sshll.u32 %s275_s15, 4  ;;  %s276_s20 = smov 128   ;;  %s29_s16 = int_to_ptr.vmem [resolvable:$true] %s28_s16 }
   0x4   :  { %s277_s21 = smov 8   ;;  %s278_s22 = smov [#allocation2]  }
   0x5   :  { %34 = dma.hbm_to_vmem [thread:$0]  %s27_s14, 4096, %s29_s16, [#allocation6], %s276_s20, %s276_s20, %s277_s21  }
   0x6   :  { %s18_s23 = sshll.u32 %s278_s22, 4  ;;  %s39_s26 = sshll.u32 %s317_s2, 4  ;;  %s19_s23 = int_to_ptr.vmem [resolvable:$true] %s18_s23  ;;  %s40_s26 = int_to_ptr.hbm [resolvable:$true] %s39_s26 }
   0x7   :  { %21 = dma.hbm_to_vmem [thread:$0]  %s17_s19, 128, %s19_s23, [#allocation3]  }
   0x8   :  { %s279_s1 = smov [#allocation7]   ;;  %s280_s28 = smov 16  }
   0x9   :  { %s41_s27 = sshll.u32 %s279_s1, 4  ;;  %s281_s29 = smov 1   ;;  %s42_s27 = int_to_ptr.vmem [resolvable:$true] %s41_s27 }
   0xa   :  { %47 = dma.hbm_to_vmem [thread:$0]  %s40_s26, 32, %s42_s27, [#allocation6], %s280_s28, %s280_s28, %s281_s29  }
   0xb   :  { %269 = dma.done.wait [#allocation3], 128  }
   0xc   :  { %270 = vsyncadd [#allocation3], 4294967168 }
   0xd   :  { %271 = dma.done.wait [#allocation6], 4128  }
   0xe   :  { %272 = vsyncadd [#allocation6], 4294963168  ;;  %v76_v0 = vld [vmem:[#allocation5 + $0x78] sm:$0xff]  ;;  %v75_v1 = vld [vmem:[#allocation5 + $0x70] sm:$0xff]  ;;  %s282_s0 = smov [#allocation8]   ;;  %s152_s5 = sshll.u32 %s318_s3, 4  ;;  %s153_s5 = int_to_ptr.hbm [resolvable:$true] %s152_s5 }
   0xf   :  { %81 = vmatpush.msra.mxu0 %v76_v0  ;;  %v74_v2 = vld [vmem:[#allocation5 + $0x68] sm:$0xff]  ;;  %v73_v3 = vld [vmem:[#allocation5 + $0x60] sm:$0xff]  ;;  %v118_v4 = vld [vmem:[#allocation5 + $0xf8] sm:$0xff]  ;;  %s150_s2 = sshll.u32 %s282_s0, 4  ;;  %s151_s2 = int_to_ptr.vmem [resolvable:$true] %s150_s2 }
  0x10   :  { %v72_v5 = vld [vmem:[#allocation5 + $0x58] sm:$0xff]  ;;  %124 = vmatpush.msra.mxu1 %v118_v4  ;;  %v117_v6 = vld [vmem:[#allocation5 + $0xf0] sm:$0xff]  ;;  %v116_v7 = vld [vmem:[#allocation5 + $0xe8] sm:$0xff] }
  0x11   :  { %82 = vmatpush.msra.mxu0 %v75_v1  ;;  %v71_v8 = vld [vmem:[#allocation5 + $0x50] sm:$0xff]  ;;  %v115_v9 = vld [vmem:[#allocation5 + $0xe0] sm:$0xff]  ;;  %v70_v10 = vld [vmem:[#allocation5 + $0x48] sm:$0xff] }
  0x12   :  { %125 = vmatpush.msra.mxu1 %v117_v6  ;;  %v114_v11 = vld [vmem:[#allocation5 + $0xd8] sm:$0xff]  ;;  %v69_v12 = vld [vmem:[#allocation5 + $0x40] sm:$0xff]  ;;  %v113_v13 = vld [vmem:[#allocation5 + $0xd0] sm:$0xff] }
  0x13   :  { %83 = vmatpush.msra.mxu0 %v74_v2  ;;  %v68_v14 = vld [vmem:[#allocation5 + $0x38] sm:$0xff]  ;;  %v112_v15 = vld [vmem:[#allocation5 + $0xc8] sm:$0xff]  ;;  %v67_v16 = vld [vmem:[#allocation5 + $0x30] sm:$0xff] }
  0x14   :  { %126 = vmatpush.msra.mxu1 %v116_v7  ;;  %v111_v17 = vld [vmem:[#allocation5 + $0xc0] sm:$0xff]  ;;  %v66_v18 = vld [vmem:[#allocation5 + $0x28] sm:$0xff]  ;;  %v110_v19 = vld [vmem:[#allocation5 + $0xb8] sm:$0xff] }
  0x15   :  { %84 = vmatpush.msra.mxu0 %v73_v3  ;;  %v65_v20 = vld [vmem:[#allocation5 + $0x20] sm:$0xff]  ;;  %v109_v21 = vld [vmem:[#allocation5 + $0xb0] sm:$0xff]  ;;  %v64_v22 = vld [vmem:[#allocation5 + $0x18] sm:$0xff] }
  0x16   :  { %127 = vmatpush.msra.mxu1 %v115_v9  ;;  %v108_v23 = vld [vmem:[#allocation5 + $0xa8] sm:$0xff]  ;;  %v63_v24 = vld [vmem:[#allocation5 + $0x10] sm:$0xff]  ;;  %v107_v25 = vld [vmem:[#allocation5 + $0xa0] sm:$0xff] }
  0x17   :  { %85 = vmatpush.msra.mxu0 %v72_v5  ;;  %v62_v26 = vld [vmem:[#allocation5 + $0x8] sm:$0xff]  ;;  %v106_v27 = vld [vmem:[#allocation5 + $0x98] sm:$0xff]  ;;  %v61_v28 = vld [vmem:[#allocation5] sm:$0xff] }
  0x18   :  { %128 = vmatpush.msra.mxu1 %v114_v11  ;;  %v60_v29 = vld [vmem:[#allocation2] sm:$0xff]  ;;  %v105_v30 = vld [vmem:[#allocation5 + $0x90] sm:$0xff]  ;;  %v104_v31 = vld [vmem:[#allocation5 + $0x88] sm:$0xff] }
  0x19   :  { %86 = vmatpush.msra.mxu0 %v71_v8  ;;  %v103_v32 = vld [vmem:[#allocation5 + $0x80] sm:$0xff] }
  0x1a   :  { %129 = vmatpush.msra.mxu1 %v113_v13  ;;  %v171_v33 = vld [vmem:[#allocation7] ss:$0 sm:$0xff]  ;;  %v172_v37 = vld [vmem:[#allocation7 + $0x1] ss:$0 sm:$0xff] }
  0x1b   :  { %87 = vmatpush.msra.mxu0 %v70_v10 }
  0x1c   :  { %130 = vmatpush.msra.mxu1 %v112_v15 }
  0x1d   :  { %88 = vmatpush.msra.mxu0 %v69_v12 }
  0x1e   :  { %131 = vmatpush.msra.mxu1 %v111_v17 }
  0x1f   :  { %89 = vmatpush.msra.mxu0 %v68_v14 }
  0x20   :  { %132 = vmatpush.msra.mxu1 %v110_v19 }
  0x21   :  { %90 = vmatpush.msra.mxu0 %v67_v16 }
  0x22   :  { %133 = vmatpush.msra.mxu1 %v109_v21 }
  0x23   :  { %91 = vmatpush.msra.mxu0 %v66_v18 }
  0x24   :  { %134 = vmatpush.msra.mxu1 %v108_v23 }
  0x25   :  { %92 = vmatpush.msra.mxu0 %v65_v20 }
  0x26   :  { %135 = vmatpush.msra.mxu1 %v107_v25 }
  0x27   :  { %93 = vmatpush.msra.mxu0 %v64_v22 }
  0x28   :  { %136 = vmatpush.msra.mxu1 %v106_v27 }
  0x29   :  { %94 = vmatpush.msra.mxu0 %v63_v24 }
  0x2a   :  { %137 = vmatpush.msra.mxu1 %v105_v30 }
  0x2b   :  { %95 = vmatpush.msra.mxu0 %v62_v26 }
  0x2c   :  { %138 = vmatpush.msra.mxu1 %v104_v31 }
  0x2d   :  { %96 = vmatpush.msra.mxu0 %v61_v28 }
  0x2e   :  { %97 = vmatmul.f32.vlgmr.msra.gmra.mxu0 %v60_v29  ;;  %139 = vmatpush.msra.mxu1 %v103_v32 }
  0xab   :  { %v98_v34 = vpop.f32.mrf.mxu0 }
  0xac   :  { %v99_v35 = vadd.f32 %v171_v33, %v98_v34 }
  0xae   :  { %v101_v36 = vmax.f32 %v99_v35, 0.0 }
  0xb0   :  { %140 = vmatmul.f32.vlgmr.msra.gmra.mxu1 %v101_v36 }
 0x12d   :  { %v141_v38 = vpop.f32.mrf.mxu1 }
 0x12e   :  { %v142_v39 = vadd.f32 %v172_v37, %v141_v38 }
 0x130   :  { %144 = vst [vmem:[#allocation8] sm:$0xff] %v142_v39 }
 0x131   :  { %155 = dma.vmem_to_hbm [thread:$0]  %s151_s2, 128, %s153_s5, [#allocation4]  }
 0x132   :  { %273 = dma.done.wait [#allocation4], 128  }
 0x133   :  { %274 = vsyncadd [#allocation4], 4294967168 }
 0x134   :  { %160 = vsyncpa [#allocation3], 1 }
 0x135   :  { %161 = vsyncpa [#allocation6], 1 }
 0x136   :  { %162 = vsyncpa [#allocation4], 1 }

</bundles_post_ra>
